<compile_context>
chip_gen: v7x
topology: tpu7x:2x2x1
jax: 0.10.0
libtpu: 0.0.40
codegen_flags: <defaults>
</compile_context>

<pallas_src>
import functools

import jax
import jax.numpy as jnp
from jax import lax
from jax.experimental import pallas as pl
from jax.experimental.pallas import tpu as pltpu


def _vad_cond_kernel(vad_ref, hist_ref, w_va_ref, w_h_ref, b_ref, g_ref,
                     gamma_ref, beta_ref, o_ref, *, inv_d, eps):
    """Fused Linear(2->D) + Linear(H->D) + LayerNorm(D) on lane-packed rows.

    Each physical row carries R logical rows (R = 128//D when packed, else 1).
    Weights are block-diagonal, LN params are lane-tiled, and `g_ref` is the
    0/1 group matrix that turns a lane-wise dot into per-logical-row sums.
    f32 accumulation throughout.
    """
    hi = lax.Precision.HIGHEST  # exact-ish f32 MXU passes; MXU has huge slack

    v = jnp.dot(vad_ref[...], w_va_ref[...],
                preferred_element_type=jnp.float32, precision=hi)
    v = v + jnp.dot(hist_ref[...], w_h_ref[...],
                    preferred_element_type=jnp.float32, precision=hi)
    v = v + b_ref[...]

    # Two-pass LayerNorm over each logical D-lane group (accuracy; the group
    # dots are free in this mem-bound kernel).  Divisor is 1/D (logical D).
    mean = jnp.dot(v, g_ref[...],
                   preferred_element_type=jnp.float32, precision=hi) * inv_d
    c = v - mean
    var = jnp.dot(c * c, g_ref[...],
                  preferred_element_type=jnp.float32, precision=hi) * inv_d
    normed = c * lax.rsqrt(var + eps)
    o_ref[...] = (normed * gamma_ref[...] + beta_ref[...]).astype(o_ref.dtype)


def _block_diag(w, r):
    """(K, D) -> (r*K, r*D) block-diagonal; off-block entries are exactly 0."""
    if r == 1:
        return w
    k, d = w.shape
    out = jnp.zeros((r * k, r * d), w.dtype)
    for i in range(r):
        out = out.at[i * k:(i + 1) * k, i * d:(i + 1) * d].set(w)
    return out


def vad_condition_pallas(vad, va_history, params, *, tm=4096, out_dtype=None):
    """vad: (B,T,2); va_history: (B,T,H) -> LayerNorm(vad@Wv + hist@Wh + b): (B,T,D)."""
    B, T, two = vad.shape
    assert two == 2
    H = va_history.shape[-1]
    D = params["w_va"].shape[1]
    BT = B * T
    if out_dtype is None:
        out_dtype = vad.dtype  # f32 by default (PyTorch semantics)

    # --- lane-dense row packing (biggest single lever for this mem-bound op) ---
    if D < 128 and 128 % D == 0 and BT % (128 // D) == 0:
        R = 128 // D
    else:
        R = 1  # TODO(synk): B*T ragged w.r.t. the pack factor falls back to the
               #             lane-padded (masked-store) layout.
    rows = BT // R
    KD = R * D

    # Contiguous reshapes only (free): no concat / pad / slice HBM copies.
    x_va = vad.reshape(rows, R * 2)
    x_h = va_history.reshape(rows, R * H)

    # Packed parameters (tiny; constant-fold under jit).  Off-block zeros and
    # the 1/D divisor keep the per-group LN statistics exact.
    w_va_blk = _block_diag(params["w_va"], R)                   # (R*2, KD)
    w_h_blk = _block_diag(params["w_h"], R)                     # (R*H, KD)
    b_blk = jnp.tile(params["b_va"] + params["b_h"], (1, R))    # (1, KD)
    gamma_blk = jnp.tile(params["gamma"], (1, R))               # (1, KD)
    beta_blk = jnp.tile(params["beta"], (1, R))                 # (1, KD)
    gid = jnp.arange(KD) // D
    g_mat = (gid[:, None] == gid[None, :]).astype(jnp.float32)  # (KD, KD)

    # --- row tiling ------------------------------------------------------------
    # Large tiles amortize the ~0.35us/step fixed cost; tm=4096 packed is about
    # 12 MiB double-buffered (under v5e's 16 MiB / v6e-v7x's 32 MiB defaults).
    tm_eff = min(tm, rows)
    if tm_eff == rows and rows >= 16:
        tm_eff = (rows // 2 + 7) // 8 * 8   # keep >= 2 grid steps (v7x: 2 TCs)
    if tm_eff != rows:
        tm_eff = max(8, (tm_eff // 8) * 8)  # sublane-aligned partial-block tiling
    grid = (pl.cdiv(rows, tm_eff),)         # ragged last block masked by Pallas

    row_map = lambda i: (i, 0)
    rep_map = lambda i: (0, 0)

    out_itemsize = jnp.dtype(out_dtype).itemsize
    cost = pl.CostEstimate(
        flops=2 * BT * (2 + H) * D + 2 * 2 * rows * KD * KD,
        transcendentals=rows * KD,
        bytes_accessed=(4 * BT * (2 + H) + out_itemsize * BT * D
                        + 4 * (R * (2 + H) * KD + KD * KD + 3 * KD)),
    )

    kernel = functools.partial(_vad_cond_kernel, inv_d=1.0 / D, eps=1e-5)

    out2d = pl.pallas_call(
        kernel,
        out_shape=jax.ShapeDtypeStruct((rows, KD), out_dtype),
        grid_spec=pltpu.PrefetchScalarGridSpec(
            num_scalar_prefetch=0,
            grid=grid,
            in_specs=[
                pl.BlockSpec((tm_eff, R * 2), row_map),   # packed vad rows
                pl.BlockSpec((tm_eff, R * H), row_map),   # packed history rows
                pl.BlockSpec((R * 2, KD), rep_map),       # block-diag W_va
                pl.BlockSpec((R * H, KD), rep_map),       # block-diag W_hist
                pl.BlockSpec((1, KD), rep_map),           # fused bias (b_va + b_h)
                pl.BlockSpec((KD, KD), rep_map),          # 0/1 group-sum matrix
                pl.BlockSpec((1, KD), rep_map),           # LN gamma (lane-tiled)
                pl.BlockSpec((1, KD), rep_map),           # LN beta (lane-tiled)
            ],
            out_specs=pl.BlockSpec((tm_eff, KD), row_map),
        ),
        compiler_params=pltpu.CompilerParams(
            dimension_semantics=("parallel",)),
        cost_estimate=cost,
    )(x_va, x_h, w_va_blk, w_h_blk, b_blk, g_mat, gamma_blk, beta_blk)

    return out2d.reshape(B, T, D)


def audio_condition_forward(params, *, va, va_history, waveform=None):
    """AudioCondition.forward for the config documented at the top of the file.

    encoder / encoder_separated are Identity (unused); vc = VadCondition(va,
    va_history); audio_module is nn.Identity(), so z = vc.
    """
    vc = vad_condition_pallas(va, va_history, params)
    return vc


def init_params(key, *, output_size, history_bins):
    """Deterministic synthetic parameters (shapes match VadCondition.__init__)."""
    k1, k2, k3, k4 = jax.random.split(key, 4)
    D, H = output_size, history_bins
    # nn.Linear(2, D): weight (D, 2) stored transposed -> (2, D); bias (D,)
    w_va = jax.random.normal(k1, (2, D), jnp.float32) * 0.5
    b_va = jax.random.normal(k2, (1, D), jnp.float32) * 0.1
    # nn.Linear(H, D): weight (D, H) stored transposed -> (H, D); bias (D,)
    w_h = jax.random.normal(k3, (H, D), jnp.float32) * 0.5
    b_h = jax.random.normal(k4, (1, D), jnp.float32) * 0.1
    # nn.LayerNorm(D): gamma=1, beta=0 (PyTorch default init)
    gamma = jnp.ones((1, D), jnp.float32)
    beta = jnp.zeros((1, D), jnp.float32)
    return {"w_va": w_va, "b_va": b_va, "w_h": w_h, "b_h": b_h,
            "gamma": gamma, "beta": beta}


def _reference(params, va, va_history):
    """Pure-JAX reference (unfused, two-pass LN) for a sanity check."""
    hi = lax.Precision.HIGHEST
    v = jnp.dot(va, params["w_va"], precision=hi) + params["b_va"][0]
    v = v + jnp.dot(va_history, params["w_h"], precision=hi) + params["b_h"][0]
    mean = v.mean(-1, keepdims=True)
    var = ((v - mean) ** 2).mean(-1, keepdims=True)
    return (v - mean) / jnp.sqrt(var + 1e-5) * params["gamma"][0] + params["beta"][0]


if __name__ == "__main__":
    D = 32     # conf['va_cond']['output_size']
    H = 5      # conf['va_cond']['history_bins']

    key = jax.random.PRNGKey(0)
    kp, kv, kh, kv2, kh2 = jax.random.split(key, 5)
    params = init_params(kp, output_size=D, history_bins=H)

    # Case 1: B*T divisible by 128//D -> lane-dense packed path (R = 4).
    B, T = 2, 8
    va = jax.random.bernoulli(kv, 0.5, (B, T, 2)).astype(jnp.float32)
    va_history = jax.random.uniform(kh, (B, T, H), jnp.float32)
    z = audio_condition_forward(params, va=va, va_history=va_history)
    z = jax.block_until_ready(z)
    ref = _reference(params, va, va_history)
    assert z.shape == (B, T, D)
    assert jnp.allclose(z, ref, atol=1e-4, rtol=1e-4), "packed path mismatch"

    # Case 2: ragged B*T (not divisible by 4) -> unpacked fallback path (R = 1).
    B2, T2 = 2, 7
    va2 = jax.random.bernoulli(kv2, 0.5, (B2, T2, 2)).astype(jnp.float32)
    va_history2 = jax.random.uniform(kh2, (B2, T2, H), jnp.float32)
    z2 = audio_condition_forward(params, va=va2, va_history=va_history2)
    z2 = jax.block_until_ready(z2)
    ref2 = _reference(params, va2, va_history2)
    assert z2.shape == (B2, T2, D)
    assert jnp.allclose(z2, ref2, atol=1e-4, rtol=1e-4), "fallback path mismatch"

    print("KERNEL_OK")
</pallas_src>

<mosaic_0001>
module attributes {stable_mosaic.version = 11 : i64} {
  func.func @_vad_cond_kernel(%arg0: i32, %arg1: memref<4x8xf32, #tpu.memory_space<vmem>>, %arg2: memref<4x20xf32, #tpu.memory_space<vmem>>, %arg3: memref<8x128xf32, #tpu.memory_space<vmem>>, %arg4: memref<20x128xf32, #tpu.memory_space<vmem>>, %arg5: memref<1x128xf32, #tpu.memory_space<vmem>>, %arg6: memref<128x128xf32, #tpu.memory_space<vmem>>, %arg7: memref<1x128xf32, #tpu.memory_space<vmem>>, %arg8: memref<1x128xf32, #tpu.memory_space<vmem>>, %arg9: memref<4x128xf32, #tpu.memory_space<vmem>>) attributes {dimension_semantics = [#tpu.dimension_semantics<parallel>], iteration_bounds = array<i64: 1>, scalar_prefetch = 0 : i64, scratch_operands = 0 : i64, tpu.core_type = #tpu.core_type<tc>, window_params = [{transform_indices = @transform_0, window_bounds = array<i64: 4, 8>}, {transform_indices = @transform_1, window_bounds = array<i64: 4, 20>}, {pipeline_mode = #tpu.pipeline_mode<synchronous>, transform_indices = @transform_2, window_bounds = array<i64: 8, 128>}, {pipeline_mode = #tpu.pipeline_mode<synchronous>, transform_indices = @transform_3, window_bounds = array<i64: 20, 128>}, {pipeline_mode = #tpu.pipeline_mode<synchronous>, transform_indices = @transform_4, window_bounds = array<i64: 1, 128>}, {pipeline_mode = #tpu.pipeline_mode<synchronous>, transform_indices = @transform_5, window_bounds = array<i64: 128, 128>}, {pipeline_mode = #tpu.pipeline_mode<synchronous>, transform_indices = @transform_6, window_bounds = array<i64: 1, 128>}, {pipeline_mode = #tpu.pipeline_mode<synchronous>, transform_indices = @transform_7, window_bounds = array<i64: 1, 128>}, {transform_indices = @transform_8, window_bounds = array<i64: 4, 128>}]} {
    %c0 = arith.constant 0 : index
    %c0_0 = arith.constant 0 : index
    %0 = vector.load %arg1[%c0, %c0_0] : memref<4x8xf32, #tpu.memory_space<vmem>>, vector<4x8xf32>
    %c0_1 = arith.constant 0 : index
    %c0_2 = arith.constant 0 : index
    %1 = vector.load %arg3[%c0_1, %c0_2] : memref<8x128xf32, #tpu.memory_space<vmem>>, vector<8x128xf32>
    %cst = arith.constant dense<0.000000e+00> : vector<4x128xf32>
    %2 = tpu.matmul %0, %1, %cst {dimension_numbers = #tpu.dot_dimension_numbers<[1], [0], [0], [1], [0, 0, 1, 1], [], []>, precision = #tpu.contract_precision<fp32>} : vector<4x8xf32>, vector<8x128xf32>, vector<4x128xf32> -> vector<4x128xf32>
    %c0_3 = arith.constant 0 : index
    %c0_4 = arith.constant 0 : index
    %3 = vector.load %arg2[%c0_3, %c0_4] : memref<4x20xf32, #tpu.memory_space<vmem>>, vector<4x20xf32>
    %c0_5 = arith.constant 0 : index
    %c0_6 = arith.constant 0 : index
    %4 = vector.load %arg4[%c0_5, %c0_6] : memref<20x128xf32, #tpu.memory_space<vmem>>, vector<20x128xf32>
    %cst_7 = arith.constant dense<0.000000e+00> : vector<4x128xf32>
    %5 = tpu.matmul %3, %4, %cst_7 {dimension_numbers = #tpu.dot_dimension_numbers<[1], [0], [0], [1], [0, 0, 1, 1], [], []>, precision = #tpu.contract_precision<fp32>} : vector<4x20xf32>, vector<20x128xf32>, vector<4x128xf32> -> vector<4x128xf32>
    %6 = arith.addf %2, %5 : vector<4x128xf32>
    %c0_8 = arith.constant 0 : index
    %c0_9 = arith.constant 0 : index
    %7 = vector.load %arg5[%c0_8, %c0_9] : memref<1x128xf32, #tpu.memory_space<vmem>>, vector<1x128xf32>
    %8 = vector.broadcast %7 : vector<1x128xf32> to vector<4x128xf32>
    %9 = arith.addf %6, %8 : vector<4x128xf32>
    %c0_10 = arith.constant 0 : index
    %c0_11 = arith.constant 0 : index
    %10 = vector.load %arg6[%c0_10, %c0_11] : memref<128x128xf32, #tpu.memory_space<vmem>>, vector<128x128xf32>
    %cst_12 = arith.constant dense<0.000000e+00> : vector<4x128xf32>
    %11 = tpu.matmul %9, %10, %cst_12 {dimension_numbers = #tpu.dot_dimension_numbers<[1], [0], [0], [1], [0, 0, 1, 1], [], []>, precision = #tpu.contract_precision<fp32>} : vector<4x128xf32>, vector<128x128xf32>, vector<4x128xf32> -> vector<4x128xf32>
    %cst_13 = arith.constant 3.125000e-02 : f32
    %12 = vector.broadcast %cst_13 : f32 to vector<4x128xf32>
    %13 = arith.mulf %11, %12 : vector<4x128xf32>
    %14 = arith.subf %9, %13 : vector<4x128xf32>
    %15 = arith.mulf %14, %14 : vector<4x128xf32>
    %c0_14 = arith.constant 0 : index
    %c0_15 = arith.constant 0 : index
    %16 = vector.load %arg6[%c0_14, %c0_15] : memref<128x128xf32, #tpu.memory_space<vmem>>, vector<128x128xf32>
    %cst_16 = arith.constant dense<0.000000e+00> : vector<4x128xf32>
    %17 = tpu.matmul %15, %16, %cst_16 {dimension_numbers = #tpu.dot_dimension_numbers<[1], [0], [0], [1], [0, 0, 1, 1], [], []>, precision = #tpu.contract_precision<fp32>} : vector<4x128xf32>, vector<128x128xf32>, vector<4x128xf32> -> vector<4x128xf32>
    %cst_17 = arith.constant 3.125000e-02 : f32
    %18 = vector.broadcast %cst_17 : f32 to vector<4x128xf32>
    %19 = arith.mulf %17, %18 : vector<4x128xf32>
    %cst_18 = arith.constant 9.99999974E-6 : f32
    %20 = vector.broadcast %cst_18 : f32 to vector<4x128xf32>
    %21 = arith.addf %19, %20 : vector<4x128xf32>
    %22 = math.rsqrt %21 : vector<4x128xf32>
    %23 = arith.mulf %14, %22 : vector<4x128xf32>
    %c0_19 = arith.constant 0 : index
    %c0_20 = arith.constant 0 : index
    %24 = vector.load %arg7[%c0_19, %c0_20] : memref<1x128xf32, #tpu.memory_space<vmem>>, vector<1x128xf32>
    %25 = vector.broadcast %24 : vector<1x128xf32> to vector<4x128xf32>
    %26 = arith.mulf %23, %25 : vector<4x128xf32>
    %c0_21 = arith.constant 0 : index
    %c0_22 = arith.constant 0 : index
    %27 = vector.load %arg8[%c0_21, %c0_22] : memref<1x128xf32, #tpu.memory_space<vmem>>, vector<1x128xf32>
    %28 = vector.broadcast %27 : vector<1x128xf32> to vector<4x128xf32>
    %29 = arith.addf %26, %28 : vector<4x128xf32>
    %c0_23 = arith.constant 0 : index
    %c0_24 = arith.constant 0 : index
    %30 = vector.load %arg9[%c0_23, %c0_24] : memref<4x128xf32, #tpu.memory_space<vmem>>, vector<4x128xf32>
    tpu.vector_store %arg9[%c0_23, %c0_24], %29 {strides = array<i32>} : memref<4x128xf32, #tpu.memory_space<vmem>>, vector<4x128xf32>,
    return
  }
  func.func @transform_0(%arg0: i32) -> (i32, i32) {
    %c0_i32 = arith.constant 0 : i32
    %c0_i32_0 = arith.constant 0 : i32
    return %arg0, %c0_i32 : i32, i32
  }
  func.func @transform_1(%arg0: i32) -> (i32, i32) {
    %c0_i32 = arith.constant 0 : i32
    %c0_i32_0 = arith.constant 0 : i32
    return %arg0, %c0_i32 : i32, i32
  }
  func.func @transform_2(%arg0: i32) -> (i32, i32) {
    %c0_i32 = arith.constant 0 : i32
    %c0_i32_0 = arith.constant 0 : i32
    %c0_i32_1 = arith.constant 0 : i32
    return %c0_i32, %c0_i32_0 : i32, i32
  }
  func.func @transform_3(%arg0: i32) -> (i32, i32) {
    %c0_i32 = arith.constant 0 : i32
    %c0_i32_0 = arith.constant 0 : i32
    %c0_i32_1 = arith.constant 0 : i32
    return %c0_i32, %c0_i32_0 : i32, i32
  }
  func.func @transform_4(%arg0: i32) -> (i32, i32) {
    %c0_i32 = arith.constant 0 : i32
    %c0_i32_0 = arith.constant 0 : i32
    %c0_i32_1 = arith.constant 0 : i32
    return %c0_i32, %c0_i32_0 : i32, i32
  }
  func.func @transform_5(%arg0: i32) -> (i32, i32) {
    %c0_i32 = arith.constant 0 : i32
    %c0_i32_0 = arith.constant 0 : i32
    %c0_i32_1 = arith.constant 0 : i32
    return %c0_i32, %c0_i32_0 : i32, i32
  }
  func.func @transform_6(%arg0: i32) -> (i32, i32) {
    %c0_i32 = arith.constant 0 : i32
    %c0_i32_0 = arith.constant 0 : i32
    %c0_i32_1 = arith.constant 0 : i32
    return %c0_i32, %c0_i32_0 : i32, i32
  }
  func.func @transform_7(%arg0: i32) -> (i32, i32) {
    %c0_i32 = arith.constant 0 : i32
    %c0_i32_0 = arith.constant 0 : i32
    %c0_i32_1 = arith.constant 0 : i32
    return %c0_i32, %c0_i32_0 : i32, i32
  }
  func.func @transform_8(%arg0: i32) -> (i32, i32) {
    %c0_i32 = arith.constant 0 : i32
    %c0_i32_0 = arith.constant 0 : i32
    return %arg0, %c0_i32 : i32, i32
  }
}

</mosaic_0001>

<bundles_post_ra>
// kernel: tpu_custom_call.1
= control target key start
LH: loop header
LB: loop body
LE: loop exit
PB: predicated region body
PF: predicated region fallthrough
CT: control target
= control target key end

     0   :  { %13 = vsyncpa [#allocation3], 0  ;;  %s4369_s0 = inlined_call_operand.hbm [shape: f32[4,8], index: 0, kind: input, shape index: {}]   ;;  %s4370_s1 = inlined_call_operand.hbm [shape: f32[4,20], index: 1, kind: input, shape index: {}]   ;;  %s4371_s2 = inlined_call_operand.hbm [shape: f32[8,128], index: 2, kind: input, shape index: {}]   ;;  %s4372_s3 = inlined_call_operand.hbm [shape: f32[20,128], index: 3, kind: input, shape index: {}]   ;;  %s4373_s4 = inlined_call_operand.vmem [shape: f32[1,128], index: 4, kind: input, shape index: {}]   ;;  %s4374_s5 = inlined_call_operand.hbm [shape: f32[128,128], index: 5, kind: input, shape index: {}]   ;;  %s4375_s6 = inlined_call_operand.vmem [shape: f32[1,128], index: 6, kind: input, shape index: {}]   ;;  %s4376_s7 = inlined_call_operand.vmem [shape: f32[1,128], index: 7, kind: input, shape index: {}]   ;;  %s4377_s8 = inlined_call_operand.hbm [shape: f32[4,128], index: 8, kind: output, shape index: {}]  }
   0x1   :  { %14 = vsyncpa [#allocation6], 0 }
   0x2   :  { %15 = vsyncpa [#allocation9], 0 }
   0x3   :  { %16 = vsyncpa [#allocation4], 0  ;;  %s3601_s27 = smov [#allocation5]   ;;  %s3602_s29 = smov [#allocation8]  }
   0x4   :  { %s33_s28 = sshll.u32 %s3601_s27, 4  ;;  %s52_s30 = sshll.u32 %s3602_s29, 4  ;;  %s34_s28 = int_to_ptr.vmem [resolvable:$true] %s33_s28  ;;  %s3657_s30 = int_to_ptr.vmem [resolvable:$true] %s52_s30 }
   0x5   :  { %s3461_s11 = scalar_lea.hbm %s4370_s1, 64 }
   0x6   :  { %p3462_p0 = scmp.ne.s32.totalorder %s4370_s1, %s3461_s11  ;;  %p3465_p1 = scmp.lt.u32.totalorder %s3461_s11, %s4370_s1 }
   0x8   :  { %p3467_p2 = pnand %p3465_p1, %p3462_p0 }
   0xa   :  { %3470 = shalt.err (!%p3467_p2)
}
   0xb   :  { %s3471_s16 = scalar_lea.vmem %s34_s28, 64  ;;  %p3476_p4 = scmp.lt.s32.totalorder %s34_s28, %s34_s28 }
   0xc   :  { %p3472_p3 = scmp.ne.s32.totalorder %s34_s28, %s3471_s16  ;;  %p3477_p5 = scmp.lt.s32.totalorder %s3471_s16, %s3471_s16 }
   0xe   :  { %p3478_p6 = por %p3477_p5, %p3476_p4 }
  0x10   :  { %p3479_p7 = pnand %p3478_p6, %p3472_p3 }
  0x12   :  { %3482 = shalt.err (!%p3479_p7)
}
  0x13   :  { %36 = dma.hbm_to_vmem [thread:$0]  %s4370_s1, 64, %s34_s28, [#allocation6]  }
  0x14   :  { %s3483_s21 = scalar_lea.hbm %s4372_s3, 384 }
  0x15   :  { %p3484_p8 = scmp.ne.s32.totalorder %s4372_s3, %s3483_s21  ;;  %p3487_p9 = scmp.lt.u32.totalorder %s3483_s21, %s4372_s3 }
  0x17   :  { %p3489_p10 = pnand %p3487_p9, %p3484_p8 }
  0x19   :  { %3492 = shalt.err (!%p3489_p10)
}
  0x1a   :  { %s3493_s26 = scalar_lea.vmem %s3657_s30, 384  ;;  %p3498_p12 = scmp.lt.s32.totalorder %s3657_s30, %s3657_s30 }
  0x1b   :  { %p3494_p11 = scmp.ne.s32.totalorder %s3657_s30, %s3493_s26  ;;  %p3499_p13 = scmp.lt.s32.totalorder %s3493_s26, %s3493_s26 }
  0x1d   :  { %p3500_p0 = por %p3499_p13, %p3498_p12 }
  0x1f   :  { %p3501_p1 = pnand %p3500_p0, %p3494_p11 }
  0x21   :  { %3504 = shalt.err (!%p3501_p1)
}
  0x22   :  { %s3603_s1 = smov 128   ;;  %s3604_s27 = smov 8  }
  0x23   :  { %58 = dma.hbm_to_vmem [thread:$0]  %s4372_s3, 384, %s3657_s30, [#allocation9], %s3603_s1, %s3603_s1, %s3604_s27  }
  0x24   :  { %s3605_s9 = smov [#allocation2]   ;;  %s3606_s11 = smov [#allocation7]  }
  0x25   :  { %s23_s10 = sshll.u32 %s3605_s9, 4  ;;  %s43_s12 = sshll.u32 %s3606_s11, 4  ;;  %s24_s10 = int_to_ptr.vmem [resolvable:$true] %s23_s10  ;;  %s44_s12 = int_to_ptr.vmem [resolvable:$true] %s43_s12 }
  0x26   :  { %s3505_s15 = scalar_lea.hbm %s4369_s0, 64 }
  0x27   :  { %p3506_p2 = scmp.ne.s32.totalorder %s4369_s0, %s3505_s15  ;;  %p3509_p3 = scmp.lt.u32.totalorder %s3505_s15, %s4369_s0 }
  0x29   :  { %p3511_p4 = pnand %p3509_p3, %p3506_p2 }
  0x2b   :  { %3514 = shalt.err (!%p3511_p4)
}
  0x2c   :  { %s3515_s3 = scalar_lea.vmem %s24_s10, 64  ;;  %p3520_p6 = scmp.lt.s32.totalorder %s24_s10, %s24_s10 }
  0x2d   :  { %p3516_p5 = scmp.ne.s32.totalorder %s24_s10, %s3515_s3  ;;  %p3521_p7 = scmp.lt.s32.totalorder %s3515_s3, %s3515_s3 }
  0x2f   :  { %p3522_p8 = por %p3521_p7, %p3520_p6 }
  0x31   :  { %p3523_p9 = pnand %p3522_p8, %p3516_p5 }
  0x33   :  { %3526 = shalt.err (!%p3523_p9)
}
  0x34   :  { %26 = dma.hbm_to_vmem [thread:$0]  %s4369_s0, 64, %s24_s10, [#allocation3]  }
  0x35   :  { %s3527_s23 = scalar_lea.hbm %s4371_s2, 128 }
  0x36   :  { %p3528_p10 = scmp.ne.s32.totalorder %s4371_s2, %s3527_s23  ;;  %p3531_p11 = scmp.lt.u32.totalorder %s3527_s23, %s4371_s2 }
  0x38   :  { %p3533_p12 = pnand %p3531_p11, %p3528_p10 }
  0x3a   :  { %3536 = shalt.err (!%p3533_p12)
}
  0x3b   :  { %s3537_s29 = scalar_lea.vmem %s44_s12, 128  ;;  %p3542_p0 = scmp.lt.s32.totalorder %s44_s12, %s44_s12 }
  0x3c   :  { %p3538_p13 = scmp.ne.s32.totalorder %s44_s12, %s3537_s29  ;;  %p3543_p1 = scmp.lt.s32.totalorder %s3537_s29, %s3537_s29 }
  0x3e   :  { %p3544_p2 = por %p3543_p1, %p3542_p0 }
  0x40   :  { %p3545_p3 = pnand %p3544_p2, %p3538_p13 }
  0x42   :  { %3548 = shalt.err (!%p3545_p3)
}
  0x43   :  { %46 = dma.hbm_to_vmem [thread:$0]  %s4371_s2, 128, %s44_s12, [#allocation6]  }
  0x44   :  { %s3607_s10 = smov [#allocation10]   ;;  %s3549_s15 = scalar_lea.hbm %s4374_s5, 2048 }
  0x45   :  { %s66_s11 = sshll.u32 %s3607_s10, 4  ;;  %p3550_p4 = scmp.ne.s32.totalorder %s4374_s5, %s3549_s15  ;;  %s67_s11 = int_to_ptr.vmem [resolvable:$true] %s66_s11 }
  0x46   :  { %p3553_p5 = scmp.lt.u32.totalorder %s3549_s15, %s4374_s5 }
  0x48   :  { %p3555_p6 = pnand %p3553_p5, %p3550_p4 }
  0x4a   :  { %3558 = shalt.err (!%p3555_p6)
}
  0x4b   :  { %s3559_s3 = scalar_lea.vmem %s67_s11, 2048  ;;  %p3564_p8 = scmp.lt.s32.totalorder %s67_s11, %s67_s11 }
  0x4c   :  { %p3560_p7 = scmp.ne.s32.totalorder %s67_s11, %s3559_s3  ;;  %p3565_p9 = scmp.lt.s32.totalorder %s3559_s3, %s3559_s3 }
  0x4e   :  { %p3566_p10 = por %p3565_p9, %p3564_p8 }
  0x50   :  { %p3567_p11 = pnand %p3566_p10, %p3560_p7 }
  0x52   :  { %3570 = shalt.err (!%p3567_p11)
}
  0x53   :  { %72 = dma.hbm_to_vmem [thread:$0]  %s4374_s5, 2048, %s67_s11, [#allocation9], %s3603_s1, %s3603_s1, %s3604_s27  }
  0x54   :  { %3593 = dma.done.wait [#allocation3], 64  }
  0x55   :  { %3594 = vsyncadd [#allocation3], 4294967232 }
  0x56   :  { %3595 = dma.done.wait [#allocation6], 192  }
  0x57   :  { %3596 = vsyncadd [#allocation6], 4294967104 }
  0x58   :  { %3597 = dma.done.wait [#allocation9], 2432  }
  0x59   :  { %3598 = vsyncadd [#allocation9], 4294964864  ;;  %v3608_v0 = vmov 0.0|0.0   ;;  %vm3609_vm0 = vmmov 0   ;;  %v3610_v1 = vmov 0.0   ;;  %vm102_vm1 = vcmask 1043456  }
  0x5a   :  { %3122 = vmatprep.subr.bf16.mxu0 %v3608_v0  ;;  %3125 = vmatprep.subr.bf16.mxu1 %v3608_v0  ;;  %vm98_vm2 = vcmask 162816   ;;  %v95_v2 = vld [vmem:[#allocation8] sm:$0xff]  ;;  %v96_v3 = vld [vmem:[#allocation8 + $0x8] sm:$0xff]  ;;  %v97_v4 = vld [vmem:[#allocation8 + $0x10] sm:$0xf]  ;;  %vm578_vm3 = vcmask 64512  }
  0x5b   :  { %2624 = vmatprep.mubr.msk.f32.mxu0 %vm3609_vm0, %v3610_v1  ;;  %2633 = vmatprep.mubr.msk.f32.mxu1 %vm3609_vm0, %v3610_v1  ;;  %v107_v5 = vand.u32 4294901760, %v95_v2  ;;  %v110_v6 = vand.u32 4294901760, %v96_v3  ;;  %v104_v7 = vsel %vm102_vm1, %v97_v4, 0  ;;  %v94_v8 = vld [vmem:[#allocation5] sm:$0xf]  ;;  %v93_v24 = vld [vmem:[#allocation7] sm:$0xff] }
  0x5c   :  { %v3736_v9 = vand.u32 4294901760, %v104_v7  ;;  %v100_v10 = vsel %vm98_vm2, %v94_v8, 0  ;;  %v92_v19 = vld [vmem:[#allocation2] sm:$0xf]  ;;  %v583_v33 = vand.u32 4294901760, %v93_v24  ;;  %v1036_v45 = vld [vmem:[#allocation10] sm:$0xff] }
  0x5d   :  { %v3123_v11 = vpack.c.bf16 %v110_v6, %v107_v5  ;;  %v186_v12 = vsub.f32 %v95_v2, %v107_v5  ;;  %v193_v13 = vsub.f32 %v96_v3, %v110_v6  ;;  %v3738_v14 = vand.u32 4294901760, %v100_v10  ;;  %v1037_v46 = vld [vmem:[#allocation10 + $0x8] sm:$0xff]  ;;  %v3798_v50 = vld [vmem:[#allocation10 + $0x10] sm:$0xff]  ;;  %v3800_v51 = vld [vmem:[#allocation10 + $0x18] sm:$0xff]  ;;  %s3611_s21 = smov [#allocation11]  }
  0x5e   :  { %v200_v15 = vsub.f32 %v104_v7, %v3736_v9  ;;  %v580_v25 = vsel %vm578_vm3, %v92_v19, 0  ;;  %v660_v36 = vsub.f32 %v93_v24, %v583_v33  ;;  %v1053_v47 = vand.u32 4294901760, %v1036_v45  ;;  %v3814_v55 = vld [vmem:[#allocation10 + $0x20] sm:$0xff]  ;;  %v3816_v56 = vld [vmem:[#allocation10 + $0x28] sm:$0xff]  ;;  %v3830_v60 = vld [vmem:[#allocation10 + $0x30] sm:$0xff]  ;;  %s2364_s22 = sshll.u32 %s3611_s21, 4  ;;  %s2365_s22 = int_to_ptr.vmem [resolvable:$true] %s2364_s22 }
  0x5f   :  { %3124 = vmatpush3.bf16.msra.mxu0 %v3123_v11  ;;  %v187_v16 = vand.u32 4294901760, %v186_v12  ;;  %v194_v17 = vand.u32 4294901760, %v193_v13  ;;  %v175_v18 = vsub.f32 %v100_v10, %v3738_v14  ;;  %v3129_v30 = vpack.c.bf16 %v193_v13, %v186_v12  ;;  %v3832_v61 = vld [vmem:[#allocation10 + $0x38] sm:$0xff]  ;;  %v3846_v3 = vld [vmem:[#allocation10 + $0x40] sm:$0xff]  ;;  %v3848_v4 = vld [vmem:[#allocation10 + $0x48] sm:$0xff]  ;;  %s3571_s23 = scalar_lea.vmem %s2365_s22, 64  ;;  %p3576_p13 = scmp.lt.s32.totalorder %s2365_s22, %s2365_s22 }
  0x60   :  { %2622 = vmatprep.subr.mxu0 %v3610_v1  ;;  %v201_v20 = vand.u32 4294901760, %v200_v15  ;;  %v3745_v34 = vand.u32 4294901760, %v580_v25  ;;  %v661_v39 = vand.u32 4294901760, %v660_v36  ;;  %v1056_v48 = vand.u32 4294901760, %v1037_v46  ;;  %v3862_v8 = vld [vmem:[#allocation10 + $0x50] sm:$0xff]  ;;  %p3572_p12 = scmp.ne.s32.totalorder %s2365_s22, %s3571_s23  ;;  %p3577_p0 = scmp.lt.s32.totalorder %s3571_s23, %s3571_s23 }
  0x61   :  { %v188_v21 = vsub.f32 %v186_v12, %v187_v16  ;;  %v195_v22 = vsub.f32 %v193_v13, %v194_v17  ;;  %v176_v23 = vand.u32 4294901760, %v175_v18  ;;  %v3135_v38 = vpack.c.bf16 %v194_v17, %v187_v16  ;;  %v3878_v13 = vld [vmem:[#allocation10 + $0x60] sm:$0xff] }
  0x62   :  { %v202_v29 = vsub.f32 %v200_v15, %v201_v20  ;;  %v649_v37 = vsub.f32 %v580_v25, %v3745_v34  ;;  %v662_v41 = vsub.f32 %v660_v36, %v661_v39  ;;  %v3796_v49 = vpack.c.bf16 %v1056_v48, %v1053_v47  ;;  %p3578_p1 = por %p3577_p0, %p3576_p13 }
  0x63   :  { %2623 = vmatpush3.msra.mxu0 %v3736_v9  ;;  %v189_v26 = vand.u32 4294901760, %v188_v21  ;;  %v196_v27 = vand.u32 4294901760, %v195_v22  ;;  %v177_v28 = vsub.f32 %v175_v18, %v176_v23  ;;  %v1059_v52 = vand.u32 4294901760, %v3798_v50  ;;  %v3900_v21 = vld [vmem:[#allocation10 + $0x78] sm:$0xff] }
  0x64   :  { %3128 = vmatprep.subr.bf16.mxu0 %v3608_v0  ;;  %v203_v35 = vand.u32 4294901760, %v202_v29  ;;  %v650_v40 = vand.u32 4294901760, %v649_v37  ;;  %v663_v43 = vand.u32 4294901760, %v662_v41  ;;  %v1062_v53 = vand.u32 4294901760, %v3800_v51  ;;  %p3579_p2 = pnand %p3578_p1, %p3572_p12 }
  0x65   :  { %v3126_v31 = vpack.c.bf16 %v196_v27, %v189_v26  ;;  %v178_v32 = vand.u32 4294901760, %v177_v28  ;;  %v1065_v57 = vand.u32 4294901760, %v3814_v55  ;;  %v1068_v58 = vand.u32 4294901760, %v3816_v56 }
  0x66   :  { %v651_v42 = vsub.f32 %v649_v37, %v650_v40  ;;  %v3812_v54 = vpack.c.bf16 %v1062_v53, %v1059_v52  ;;  %v1071_v62 = vand.u32 4294901760, %v3830_v60  ;;  %v1074_v63 = vand.u32 4294901760, %v3832_v61 }
  0x67   :  { %3127 = vmatpush3.bf16.msra.mxu1 %v3126_v31  ;;  %2625 = vmatmul.mubr.f32.vlgmr.msra.gmra.mrb[0].mxu0 %v178_v32  ;;  %v3828_v59 = vpack.c.bf16 %v1068_v58, %v1065_v57  ;;  %v1077_v5 = vand.u32 4294901760, %v3846_v3  ;;  %v1080_v6 = vand.u32 4294901760, %v3848_v4  ;;  %v1083_v10 = vand.u32 4294901760, %v3862_v8 }
  0x68   :  { %3130 = vmatpush3.bf16.msra.mxu0 %v3129_v30  ;;  %2631 = vmatprep.subr.mxu1 %v3610_v1  ;;  %v652_v44 = vand.u32 4294901760, %v651_v42  ;;  %v3844_v2 = vpack.c.bf16 %v1074_v63, %v1071_v62  ;;  %v3896_v19 = vsub.f32 %v1037_v46, %v1056_v48  ;;  %v3925_v29 = vsub.f32 %v3798_v50, %v1059_v52 }
  0x69   :  { %2640 = vmatprep.subr.mxu0 %v3610_v1  ;;  %2642 = vmatprep.mubr.msk.f32.mxu0 %vm3609_vm0, %v3610_v1  ;;  %v3860_v7 = vpack.c.bf16 %v1080_v6, %v1077_v5  ;;  %v3930_v30 = vsub.f32 %v3800_v51, %v1062_v53  ;;  %v3974_v48 = vsub.f32 %v3832_v61, %v1074_v63 }
  0x6a   :  { %v4392_v25 = vand.u32 4294901760, %v3896_v19 }
  0x6b   :  { %2632 = vmatpush3.msra.mxu1 %v203_v35  ;;  %v4386_v53 = vand.u32 4294901760, %v3974_v48 }
  0x6c   :  { %2634 = vmatmul.mubr.f32.vlgmr.msra.gmra.mrb[0].mxu1 %v3738_v14  ;;  %3131 = vmatprep.subr.bf16.mxu1 %v3608_v0  ;;  %v1154_v28 = vsub.f32 %v3896_v19, %v4392_v25 }
  0x6d   :  { %2641 = vmatpush3.msra.mxu0 %v200_v15  ;;  %3133 = vmatpush3.bf16.msra.mxu1 %v3123_v11  ;;  %v1089_v15 = vand.u32 4294901760, %v3878_v13 }
  0x6e   :  { %2643 = vmatmul.mubr.f32.vlgmr.msra.gmra.mrb[2].mxu0 %v175_v18  ;;  %3134 = vmatprep.subr.bf16.mxu0 %v3608_v0  ;;  %v3894_v18 = vsub.f32 %v1036_v45, %v1053_v47  ;;  %v1155_v32 = vand.u32 4294901760, %v1154_v28  ;;  %v3969_v47 = vsub.f32 %v3830_v60, %v1071_v62  ;;  %v1196_v60 = vsub.f32 %v3974_v48, %v4386_v53 }
  0x6f   :  { %3136 = vmatpush3.bf16.msra.mxu0 %v3135_v38  ;;  %2649 = vmatprep.subr.mxu1 %v3610_v1  ;;  %v3949_v38 = vsub.f32 %v3814_v55, %v1065_v57  ;;  %v3986_v57 = vsub.f32 %v3846_v3, %v1077_v5 }
  0x70   :  { %2651 = vmatprep.mubr.msk.f32.mxu1 %vm3609_vm0, %v3610_v1  ;;  %2658 = vmatprep.subr.mxu0 %v3610_v1  ;;  %v4393_v24 = vand.u32 4294901760, %v3894_v18  ;;  %v4387_v52 = vand.u32 4294901760, %v3969_v47 }
  0x71   :  { %2650 = vmatpush3.msra.mxu1 %v3736_v9  ;;  %2660 = vmatprep.mubr.msk.f32.mxu0 %vm3609_vm0, %v3610_v1  ;;  %v4389_v42 = vand.u32 4294901760, %v3949_v38  ;;  %v4385_v62 = vand.u32 4294901760, %v3986_v57 }
  0x72   :  { %2652 = vmatmul.mubr.f32.vlgmr.msra.gmra.mrb[2].mxu1 %v176_v23  ;;  %3137 = vmatprep.subr.bf16.mxu1 %v3608_v0  ;;  %v1098_v23 = vand.u32 4294901760, %v3900_v21  ;;  %v1147_v27 = vsub.f32 %v3894_v18, %v4393_v24 }
  0x73   :  { %2659 = vmatpush3.msra.mxu0 %v201_v20  ;;  %3139 = vmatpush3.bf16.msra.mxu1 %v3123_v11  ;;  %v3898_v20 = vld [vmem:[#allocation10 + $0x70] sm:$0xff]  ;;  %v1175_v45 = vsub.f32 %v3949_v38, %v4389_v42  ;;  %v1203_v3 = vsub.f32 %v3986_v57, %v4385_v62 }
  0x74   :  { %2661 = vmatmul.mubr.f32.vlgmr.msra.gmra.mrb[4].mxu0 %v3738_v14  ;;  %2667 = vmatprep.subr.mxu1 %v3610_v1  ;;  %v1095_v22 = vand.u32 4294901760, %v3898_v20  ;;  %v1148_v31 = vand.u32 4294901760, %v1147_v27  ;;  %v1197_v27 = vand.u32 4294901760, %v1196_v60 }
  0x75   :  { %2672 = vmatprep.subr.mxu0 %v3610_v1  ;;  %2669 = vmatprep.mubr.msk.f32.mxu1 %vm3609_vm0, %v3610_v1  ;;  %v1176_v50 = vand.u32 4294901760, %v1175_v45 }
  0x76   :  { %2673 = vmatpush3.msra.mxu0 %v583_v33  ;;  %2674 = vmatprep.mubr.msk.f32.mxu0 %vm3609_vm0, %v3610_v1  ;;  %v3914_v26 = vpack.c.bf16 %v1098_v23, %v1095_v22  ;;  %v3938_v35 = vpack.c.bf16 %v1155_v32, %v1148_v31  ;;  %v1204_v31 = vand.u32 4294901760, %v1203_v3 }
  0x77   :  { %2668 = vmatpush3.msra.mxu1 %v3736_v9  ;;  %2682 = vmatprep.subr.mxu0 %v3610_v1  ;;  %v3864_v9 = vld [vmem:[#allocation10 + $0x58] sm:$0xff] }
  0x78   :  { %2670 = vmatmul.mubr.f32.vlgmr.msra.gmra.mrb[4].mxu1 %v3738_v14  ;;  %2677 = vmatprep.subr.mxu1 %v3610_v1  ;;  %v1086_v11 = vand.u32 4294901760, %v3864_v9  ;;  %v3880_v14 = vld [vmem:[#allocation10 + $0x68] sm:$0xff] }
  0x79   :  { %2678 = vmatpush3.msra.mxu1 %v663_v43  ;;  %2675 = vmatmul.mubr.f32.vlgmr.msra.gmra.mrb[6].mxu0 %v652_v44  ;;  %v1092_v16 = vand.u32 4294901760, %v3880_v14 }
  0x7a   :  { %2679 = vmatprep.mubr.msk.f32.mxu1 %vm3609_vm0, %v3610_v1  ;;  %2683 = vmatpush3.msra.mxu0 %v660_v36  ;;  %v3876_v12 = vpack.c.bf16 %v1086_v11, %v1083_v10 }
  0x7b   :  { %2687 = vmatprep.subr.mxu1 %v3610_v1  ;;  %2684 = vmatprep.mubr.msk.f32.mxu0 %vm3609_vm0, %v3610_v1  ;;  %v3892_v17 = vpack.c.bf16 %v1092_v16, %v1089_v15 }
  0x7c   :  { %2680 = vmatmul.mubr.f32.vlgmr.msra.gmra.mrb[6].mxu1 %v3745_v34  ;;  %2692 = vmatprep.subr.mxu0 %v3610_v1 }
  0x7d   :  { %2688 = vmatpush3.msra.mxu1 %v583_v33  ;;  %2685 = vmatmul.mubr.f32.vlgmr.msra.gmra.mrb[8].mxu0 %v649_v37 }
  0x7e   :  { %2689 = vmatprep.mubr.msk.f32.mxu1 %vm3609_vm0, %v3610_v1  ;;  %2693 = vmatpush3.msra.mxu0 %v661_v39  ;;  %v3954_v39 = vsub.f32 %v3816_v56, %v1068_v58  ;;  %v1189_v56 = vsub.f32 %v3969_v47, %v4387_v52  ;;  %v3991_v58 = vsub.f32 %v3848_v4, %v1080_v6 }
  0x7f   :  { %2697 = vmatprep.subr.mxu1 %v3610_v1  ;;  %2694 = vmatprep.mubr.msk.f32.mxu0 %vm3609_vm0, %v3610_v1  ;;  %v4007_v4 = vsub.f32 %v3862_v8, %v1083_v10  ;;  %v4012_v6 = vsub.f32 %v3864_v9, %v1086_v11  ;;  %v4029_v9 = vsub.f32 %v3878_v13, %v1089_v15 }
  0x80   :  { %2690 = vmatmul.mubr.f32.vlgmr.msra.gmra.mrb[8].mxu1 %v650_v40  ;;  %3140 = vmatprep.subr.bf16.mxu0 %v3608_v0  ;;  %v4388_v43 = vand.u32 4294901760, %v3954_v39  ;;  %v1190_v61 = vand.u32 4294901760, %v1189_v56  ;;  %v4384_v63 = vand.u32 4294901760, %v3991_v58  ;;  %v4034_v11 = vsub.f32 %v3880_v14, %v1092_v16 }
  0x81   :  { %2698 = vmatpush3.msra.mxu1 %v583_v33  ;;  %2695 = vmatmul.mubr.f32.vlgmr.msra.gmra.mrb[10].mxu0 %v3745_v34  ;;  %v4391_v33 = vand.u32 4294901760, %v3925_v29  ;;  %v4046_v13 = vsub.f32 %v3898_v20, %v1095_v22  ;;  %v4051_v14 = vsub.f32 %v3900_v21, %v1098_v23 }
  0x82   :  { %2699 = vmatprep.mubr.msk.f32.mxu1 %vm3609_vm0, %v3610_v1  ;;  %2734 = vmatprep.mubr.msk.f32.mxu0 %vm3609_vm0, %v3610_v1  ;;  %v1182_v46 = vsub.f32 %v3954_v39, %v4388_v43  ;;  %v1210_v5 = vsub.f32 %v3991_v58, %v4384_v63  ;;  %v4014_v28 = vpack.c.bf16 %v1197_v27, %v1190_v61 }
  0x83   :  { %3284 = vmatprep.subr.bf16.mxu1 %v3608_v0  ;;  %3142 = vmatpush3.bf16.msra.mxu0 %v3796_v49  ;;  %v1161_v36 = vsub.f32 %v3925_v29, %v4391_v33  ;;  %v4379_v60 = vand.u32 4294901760, %v4046_v13  ;;  %v4378_v61 = vand.u32 4294901760, %v4051_v14 }
  0x84   :  { %2700 = vmatmul.mubr.f32.vlgmr.msra.gmra.mrb[10].mxu1 %v3745_v34  ;;  %3143 = vmatprep.subr.bf16.mxu0 %v3608_v0  ;;  %v4390_v34 = vand.u32 4294901760, %v3930_v30  ;;  %v1183_v51 = vand.u32 4294901760, %v1182_v46  ;;  %v1211_v32 = vand.u32 4294901760, %v1210_v5  ;;  %v4381_v46 = vand.u32 4294901760, %v4029_v9 }
  0x85   :  { %2944 = vmatprep.mubr.msk.f32.mxu1 %vm3609_vm0, %v3610_v1  ;;  %3286 = vmatpush3.bf16.msra.mxu1 %v3796_v49  ;;  %v1162_v40 = vand.u32 4294901760, %v1161_v36  ;;  %v4383_v36 = vand.u32 4294901760, %v4007_v4  ;;  %v1245_v20 = vsub.f32 %v4046_v13, %v4379_v60  ;;  %v1252_v22 = vsub.f32 %v4051_v14, %v4378_v61 }
  0x86   :  { %3287 = vmatprep.subr.bf16.mxu1 %v3608_v0  ;;  %v1168_v37 = vsub.f32 %v3930_v30, %v4390_v34  ;;  %v3978_v55 = vpack.c.bf16 %v1183_v51, %v1176_v50  ;;  %v4380_v50 = vand.u32 4294901760, %v4034_v11  ;;  %v1231_v56 = vsub.f32 %v4029_v9, %v4381_v46 }
  0x87   :  { %3145 = vmatpush3.bf16.msra.mxu0 %v3812_v54  ;;  %v1217_v8 = vsub.f32 %v4007_v4, %v4383_v36  ;;  %v1246_v23 = vand.u32 4294901760, %v1245_v20  ;;  %v1253_v3 = vand.u32 4294901760, %v1252_v22 }
  0x88   :  { %3146 = vmatprep.subr.bf16.mxu0 %v3608_v0  ;;  %v1169_v41 = vand.u32 4294901760, %v1168_v37  ;;  %v4382_v37 = vand.u32 4294901760, %v4012_v6  ;;  %v1238_v15 = vsub.f32 %v4034_v11, %v4380_v50  ;;  %v1232_v16 = vand.u32 4294901760, %v1231_v56 }
  0x89   :  { %3289 = vmatpush3.bf16.msra.mxu1 %v3812_v54  ;;  %v4066_v5 = vpack.c.bf16 %v1253_v3, %v1246_v23  ;;  %v4094_v56 = vpack.c.bf16 %v4034_v11, %v4029_v9 }
  0x8a   :  { %3290 = vmatprep.subr.bf16.mxu1 %v3608_v0  ;;  %v3958_v44 = vpack.c.bf16 %v1169_v41, %v1162_v40  ;;  %v4018_v40 = vpack.c.bf16 %v1211_v32, %v1204_v31  ;;  %v1224_v10 = vsub.f32 %v4012_v6, %v4382_v37  ;;  %v1218_v41 = vand.u32 4294901760, %v1217_v8 }
  0x8b   :  { %3148 = vmatpush3.bf16.msra.mxu0 %v3828_v59  ;;  %v1239_v27 = vand.u32 4294901760, %v1238_v15  ;;  %v4070_v31 = vpack.c.bf16 %v3896_v19, %v3894_v18  ;;  %v4074_v32 = vpack.c.bf16 %v3930_v30, %v3925_v29  ;;  %v4078_v8 = vpack.c.bf16 %v3954_v39, %v3949_v38 }
  0x8c   :  { %3149 = vmatprep.subr.bf16.mxu0 %v3608_v0  ;;  %v1225_v45 = vand.u32 4294901760, %v1224_v10  ;;  %v4082_v10 = vpack.c.bf16 %v3974_v48, %v3969_v47  ;;  %v4098_v15 = vpack.c.bf16 %v4051_v14, %v4046_v13 }
  0x8d   :  { %3292 = vmatpush3.bf16.msra.mxu1 %v3828_v59  ;;  %v4064_v21 = vpack.c.bf16 %v1239_v27, %v1232_v16 }
  0x8e   :  { %3293 = vmatprep.subr.bf16.mxu1 %v3608_v0  ;;  %v4038_v51 = vpack.c.bf16 %v1225_v45, %v1218_v41  ;;  %v4086_v41 = vpack.c.bf16 %v3991_v58, %v3986_v57  ;;  %v4090_v45 = vpack.c.bf16 %v4012_v6, %v4007_v4 }
  0x8f   :  { %3151 = vmatpush3.bf16.msra.mxu0 %v3844_v2 }
  0x90   :  { %3152 = vmatprep.subr.bf16.mxu0 %v3608_v0 }
  0x91   :  { %3295 = vmatpush3.bf16.msra.mxu1 %v3844_v2 }
  0x92   :  { %3296 = vmatprep.subr.bf16.mxu1 %v3608_v0 }
  0x93   :  { %3154 = vmatpush3.bf16.msra.mxu0 %v3860_v7 }
  0x94   :  { %3155 = vmatprep.subr.bf16.mxu0 %v3608_v0 }
  0x95   :  { %3298 = vmatpush3.bf16.msra.mxu1 %v3860_v7 }
  0x96   :  { %3299 = vmatprep.subr.bf16.mxu1 %v3608_v0 }
  0x97   :  { %3157 = vmatpush3.bf16.msra.mxu0 %v3876_v12 }
  0x98   :  { %3158 = vmatprep.subr.bf16.mxu0 %v3608_v0 }
  0x99   :  { %3301 = vmatpush3.bf16.msra.mxu1 %v3876_v12 }
  0x9a   :  { %3302 = vmatprep.subr.bf16.mxu1 %v3608_v0 }
  0x9b   :  { %3160 = vmatpush3.bf16.msra.mxu0 %v3892_v17 }
  0x9c   :  { %3161 = vmatprep.subr.bf16.mxu0 %v3608_v0 }
  0x9d   :  { %3304 = vmatpush3.bf16.msra.mxu1 %v3892_v17 }
  0x9e   :  { %3305 = vmatprep.subr.bf16.mxu1 %v3608_v0 }
  0x9f   :  { %3163 = vmatpush3.bf16.msra.mxu0 %v3914_v26 }
  0xa0   :  { %3164 = vmatprep.subr.bf16.mxu0 %v3608_v0 }
  0xa1   :  { %3307 = vmatpush3.bf16.msra.mxu1 %v3914_v26 }
  0xa2   :  { %3308 = vmatprep.subr.bf16.mxu1 %v3608_v0 }
 0x13a   :  { %v180_v16 = vpop.f32.mrb[0].mxu0 }
 0x13b   :  { %v2626_v27 = vpop.f32.mrb[1].mxu0 }
 0x13f   :  { %v266_v20 = vpop.f32.mrb[0].mxu1 }
 0x140   :  { %v267_v22 = vadd.f32 %v266_v20, %v180_v16  ;;  %v2635_v23 = vpop.f32.mrb[1].mxu1 }
 0x141   :  { %v344_v3 = vpop.f32.mrb[2].mxu0 }
 0x142   :  { %v345_v61 = vadd.f32 %v344_v3, %v267_v22  ;;  %v2644_v60 = vpop.f32.mrb[3].mxu0 }
 0x145   :  { %v420_v50 = vpop.f32.mrb[2].mxu1 }
 0x146   :  { %v421_v46 = vadd.f32 %v420_v50, %v345_v61  ;;  %v2653_v37 = vpop.f32.mrb[3].mxu1 }
 0x147   :  { %v500_v36 = vpop.f32.mrb[4].mxu0 }
 0x148   :  { %v501_v63 = vadd.f32 %v500_v36, %v421_v46  ;;  %v2662_v62 = vpop.f32.mrb[5].mxu0  ;;  %v4395_v46 = vand.u32 4294901760, %v3896_v19  ;;  %v4399_v19 = vand.u32 4294901760, %v3954_v39  ;;  %v4403_v39 = vand.u32 4294901760, %v3991_v58 }
 0x149   :  { %v4407_v58 = vand.u32 4294901760, %v4034_v11 }
 0x14b   :  { %v574_v53 = vpop.f32.mrb[4].mxu1 }
 0x14c   :  { %v575_v52 = vadd.f32 %v574_v53, %v501_v63  ;;  %v2671_v43 = vpop.f32.mrb[5].mxu1  ;;  %v654_v42 = vpop.f32.mrb[6].mxu0  ;;  %v4394_v63 = vand.u32 4294901760, %v3894_v18  ;;  %v4398_v18 = vand.u32 4294901760, %v3949_v38  ;;  %v4402_v38 = vand.u32 4294901760, %v3986_v57 }
 0x14d   :  { %v2676_v34 = vpop.f32.mrb[7].mxu0  ;;  %v2375_v43 = vld [vmem:[%s4373_s4] ss:$0 sm:$0xff]  ;;  %v4406_v57 = vand.u32 4294901760, %v4029_v9 }
 0x14e   :  { %v655_v33 = vadd.f32 %v654_v42, %v575_v52 }
 0x14f   :  { %v730_v25 = vpop.f32.mrb[6].mxu1 }
 0x150   :  { %v731_v27 = vadd.f32 %v730_v25, %v655_v33  ;;  %v2681_v24 = vpop.f32.mrb[7].mxu1  ;;  %v804_v16 = vpop.f32.mrb[8].mxu0 }
 0x151   :  { %v2686_v20 = vpop.f32.mrb[9].mxu0 }
 0x152   :  { %v805_v23 = vadd.f32 %v804_v16, %v731_v27  ;;  %v4168_v27 = vpack.c.bf16 %v4395_v46, %v4394_v63  ;;  %v4396_v16 = vand.u32 4294901760, %v3925_v29  ;;  %v4397_v20 = vand.u32 4294901760, %v3930_v30 }
 0x153   :  { %v878_v22 = vpop.f32.mrb[8].mxu1  ;;  %v4400_v29 = vand.u32 4294901760, %v3969_v47  ;;  %v4401_v30 = vand.u32 4294901760, %v3974_v48  ;;  %v4404_v47 = vand.u32 4294901760, %v4007_v4  ;;  %v4405_v48 = vand.u32 4294901760, %v4012_v6 }
 0x154   :  { %v879_v60 = vadd.f32 %v878_v22, %v805_v23  ;;  %v2691_v3 = vpop.f32.mrb[9].mxu1  ;;  %v952_v50 = vpop.f32.mrb[10].mxu0  ;;  %v4176_v23 = vpack.c.bf16 %v4397_v20, %v4396_v16  ;;  %v4186_v22 = vpack.c.bf16 %v4399_v19, %v4398_v18  ;;  %v4408_v4 = vand.u32 4294901760, %v4046_v13 }
 0x155   :  { %v2696_v37 = vpop.f32.mrb[11].mxu0  ;;  %v4202_v3 = vpack.c.bf16 %v4403_v39, %v4402_v38  ;;  %v4409_v6 = vand.u32 4294901760, %v4051_v14 }
 0x156   :  { %v953_v61 = vadd.f32 %v952_v50, %v879_v60  ;;  %v4194_v60 = vpack.c.bf16 %v4401_v30, %v4400_v29  ;;  %v4210_v50 = vpack.c.bf16 %v4405_v48, %v4404_v47  ;;  %v4218_v37 = vpack.c.bf16 %v4407_v58, %v4406_v57 }
 0x157   :  { %v1024_v36 = vpop.f32.mrb[10].mxu1 }
 0x158   :  { %v1025_v53 = vadd.f32 %v1024_v36, %v953_v61  ;;  %v2701_v34 = vpop.f32.mrb[11].mxu1  ;;  %v4226_v61 = vpack.c.bf16 %v4409_v6, %v4408_v4 }
 0x15a   :  { %v4103_v42 = vadd.f32 %v2375_v43, %v1025_v53 }
 0x15c   :  { %v4106_v24 = vand.u32 4294901760, %v4103_v42 }
 0x15e   :  { %v1134_v25 = vsub.f32 %v4103_v42, %v4106_v24 }
 0x160   :  { %v1135_v33 = vand.u32 4294901760, %v1134_v25 }
 0x162   :  { %v1136_v52 = vsub.f32 %v1134_v25, %v1135_v33 }
 0x164   :  { %v1137_v62 = vand.u32 4294901760, %v1136_v52 }
 0x166   :  { %2735 = vmatmul.mubr.f32.vlgmr.msra.gmra.mrb[12].mxu0 %v1137_v62 }
 0x167   :  { %3166 = vmatpush3.bf16.msra.mxu0 %v3938_v35  ;;  %2769 = vmatprep.mubr.msk.f32.mxu0 %vm3609_vm0, %v3610_v1 }
 0x168   :  { %3167 = vmatprep.subr.bf16.mxu0 %v3608_v0 }
 0x16b   :  { %3169 = vmatpush3.bf16.msra.mxu0 %v3958_v44 }
 0x16c   :  { %3170 = vmatprep.subr.bf16.mxu0 %v3608_v0 }
 0x16f   :  { %3172 = vmatpush3.bf16.msra.mxu0 %v3978_v55 }
 0x170   :  { %3173 = vmatprep.subr.bf16.mxu0 %v3608_v0 }
 0x173   :  { %3175 = vmatpush3.bf16.msra.mxu0 %v4014_v28 }
 0x174   :  { %3176 = vmatprep.subr.bf16.mxu0 %v3608_v0 }
 0x177   :  { %3178 = vmatpush3.bf16.msra.mxu0 %v4018_v40 }
 0x178   :  { %3179 = vmatprep.subr.bf16.mxu0 %v3608_v0 }
 0x17b   :  { %3181 = vmatpush3.bf16.msra.mxu0 %v4038_v51 }
 0x17c   :  { %3182 = vmatprep.subr.bf16.mxu0 %v3608_v0 }
 0x17f   :  { %3184 = vmatpush3.bf16.msra.mxu0 %v4064_v21 }
 0x180   :  { %3185 = vmatprep.subr.bf16.mxu0 %v3608_v0 }
 0x183   :  { %3187 = vmatpush3.bf16.msra.mxu0 %v4066_v5 }
 0x184   :  { %3188 = vmatprep.subr.bf16.mxu0 %v3608_v0 }
 0x186   :  { %2770 = vmatmul.mubr.f32.vlgmr.msra.gmra.mrb[12].mxu0 %v4106_v24 }
 0x187   :  { %3190 = vmatpush3.bf16.msra.mxu0 %v4070_v31  ;;  %2804 = vmatprep.mubr.msk.f32.mxu0 %vm3609_vm0, %v3610_v1 }
 0x188   :  { %3191 = vmatprep.subr.bf16.mxu0 %v3608_v0 }
 0x18b   :  { %3193 = vmatpush3.bf16.msra.mxu0 %v4074_v32 }
 0x18c   :  { %3194 = vmatprep.subr.bf16.mxu0 %v3608_v0 }
 0x18f   :  { %3196 = vmatpush3.bf16.msra.mxu0 %v4078_v8 }
 0x190   :  { %3197 = vmatprep.subr.bf16.mxu0 %v3608_v0 }
 0x193   :  { %3199 = vmatpush3.bf16.msra.mxu0 %v4082_v10 }
 0x194   :  { %3200 = vmatprep.subr.bf16.mxu0 %v3608_v0 }
 0x197   :  { %3202 = vmatpush3.bf16.msra.mxu0 %v4086_v41 }
 0x198   :  { %3203 = vmatprep.subr.bf16.mxu0 %v3608_v0 }
 0x19b   :  { %3205 = vmatpush3.bf16.msra.mxu0 %v4090_v45 }
 0x19c   :  { %3206 = vmatprep.subr.bf16.mxu0 %v3608_v0 }
 0x19f   :  { %3208 = vmatpush3.bf16.msra.mxu0 %v4094_v56 }
 0x1a0   :  { %3209 = vmatprep.subr.bf16.mxu0 %v3608_v0 }
 0x1a3   :  { %3211 = vmatpush3.bf16.msra.mxu0 %v4098_v15 }
 0x1a4   :  { %3212 = vmatprep.subr.bf16.mxu0 %v3608_v0 }
 0x1a6   :  { %2805 = vmatmul.mubr.f32.vlgmr.msra.gmra.mrb[12].mxu0 %v1134_v25 }
 0x1a7   :  { %3214 = vmatpush3.bf16.msra.mxu0 %v3796_v49  ;;  %2839 = vmatprep.mubr.msk.f32.mxu0 %vm3609_vm0, %v3610_v1 }
 0x1a8   :  { %3215 = vmatprep.subr.bf16.mxu0 %v3608_v0 }
 0x1ab   :  { %3217 = vmatpush3.bf16.msra.mxu0 %v3812_v54 }
 0x1ac   :  { %3218 = vmatprep.subr.bf16.mxu0 %v3608_v0 }
 0x1af   :  { %3220 = vmatpush3.bf16.msra.mxu0 %v3828_v59 }
 0x1b0   :  { %3221 = vmatprep.subr.bf16.mxu0 %v3608_v0 }
 0x1b3   :  { %3223 = vmatpush3.bf16.msra.mxu0 %v3844_v2 }
 0x1b4   :  { %3224 = vmatprep.subr.bf16.mxu0 %v3608_v0 }
 0x1b7   :  { %3226 = vmatpush3.bf16.msra.mxu0 %v3860_v7 }
 0x1b8   :  { %3227 = vmatprep.subr.bf16.mxu0 %v3608_v0 }
 0x1bb   :  { %3229 = vmatpush3.bf16.msra.mxu0 %v3876_v12 }
 0x1bc   :  { %3230 = vmatprep.subr.bf16.mxu0 %v3608_v0 }
 0x1bf   :  { %3232 = vmatpush3.bf16.msra.mxu0 %v3892_v17 }
 0x1c0   :  { %3233 = vmatprep.subr.bf16.mxu0 %v3608_v0 }
 0x1c3   :  { %3235 = vmatpush3.bf16.msra.mxu0 %v3914_v26 }
 0x1c4   :  { %3236 = vmatprep.subr.bf16.mxu0 %v3608_v0 }
 0x1c6   :  { %2840 = vmatmul.mubr.f32.vlgmr.msra.gmra.mrb[12].mxu0 %v1135_v33 }
 0x1c7   :  { %3238 = vmatpush3.bf16.msra.mxu0 %v4168_v27  ;;  %2874 = vmatprep.mubr.msk.f32.mxu0 %vm3609_vm0, %v3610_v1 }
 0x1c8   :  { %3239 = vmatprep.subr.bf16.mxu0 %v3608_v0 }
 0x1cb   :  { %3241 = vmatpush3.bf16.msra.mxu0 %v4176_v23 }
 0x1cc   :  { %3242 = vmatprep.subr.bf16.mxu0 %v3608_v0 }
 0x1cf   :  { %3244 = vmatpush3.bf16.msra.mxu0 %v4186_v22 }
 0x1d0   :  { %3245 = vmatprep.subr.bf16.mxu0 %v3608_v0 }
 0x1d3   :  { %3247 = vmatpush3.bf16.msra.mxu0 %v4194_v60 }
 0x1d4   :  { %3248 = vmatprep.subr.bf16.mxu0 %v3608_v0 }
 0x1d7   :  { %3250 = vmatpush3.bf16.msra.mxu0 %v4202_v3 }
 0x1d8   :  { %3251 = vmatprep.subr.bf16.mxu0 %v3608_v0 }
 0x1db   :  { %3253 = vmatpush3.bf16.msra.mxu0 %v4210_v50 }
 0x1dc   :  { %3254 = vmatprep.subr.bf16.mxu0 %v3608_v0 }
 0x1df   :  { %3256 = vmatpush3.bf16.msra.mxu0 %v4218_v37 }
 0x1e0   :  { %3257 = vmatprep.subr.bf16.mxu0 %v3608_v0 }
 0x1e3   :  { %3259 = vmatpush3.bf16.msra.mxu0 %v4226_v61 }
 0x1e4   :  { %3260 = vmatprep.subr.bf16.mxu0 %v3608_v0 }
 0x1e6   :  { %2875 = vmatmul.mubr.f32.vlgmr.msra.gmra.mrb[12].mxu0 %v4106_v24 }
 0x1e7   :  { %3262 = vmatpush3.bf16.msra.mxu0 %v3796_v49  ;;  %2909 = vmatprep.mubr.msk.f32.mxu0 %vm3609_vm0, %v3610_v1 }
 0x1e8   :  { %3263 = vmatprep.subr.bf16.mxu0 %v3608_v0 }
 0x1eb   :  { %3265 = vmatpush3.bf16.msra.mxu0 %v3812_v54 }
 0x1ec   :  { %3266 = vmatprep.subr.bf16.mxu0 %v3608_v0 }
 0x1ef   :  { %3268 = vmatpush3.bf16.msra.mxu0 %v3828_v59 }
 0x1f0   :  { %3269 = vmatprep.subr.bf16.mxu0 %v3608_v0 }
 0x1f3   :  { %3271 = vmatpush3.bf16.msra.mxu0 %v3844_v2 }
 0x1f4   :  { %3272 = vmatprep.subr.bf16.mxu0 %v3608_v0 }
 0x1f7   :  { %3274 = vmatpush3.bf16.msra.mxu0 %v3860_v7 }
 0x1f8   :  { %3275 = vmatprep.subr.bf16.mxu0 %v3608_v0 }
 0x1fb   :  { %3277 = vmatpush3.bf16.msra.mxu0 %v3876_v12 }
 0x1fc   :  { %3278 = vmatprep.subr.bf16.mxu0 %v3608_v0 }
 0x1ff   :  { %3280 = vmatpush3.bf16.msra.mxu0 %v3892_v17 }
 0x200   :  { %3281 = vmatprep.subr.bf16.mxu0 %v3608_v0 }
 0x203   :  { %3283 = vmatpush3.bf16.msra.mxu0 %v3914_v26 }
 0x206   :  { %2910 = vmatmul.mubr.f32.vlgmr.msra.gmra.mrb[12].mxu0 %v4106_v24 }
 0x2d9   :  { %v1689_v9 = vpop.f32.mrb[12].mxu0 }
 0x2da   :  { %v1693_v11 = vmul.f32 0.03125, %v1689_v9  ;;  %v2911_v13 = vpop.f32.mrb[13].mxu0 }
 0x2dc   :  { %v4251_v14 = vsub.f32 %v4103_v42, %v1693_v11 }
 0x2de   :  { %v1695_v36 = vmul.f32 %v4251_v14, %v4251_v14 }
 0x2e0   :  { %v4255_v43 = vand.u32 4294901760, %v1695_v36 }
 0x2e2   :  { %v1778_v53 = vsub.f32 %v1695_v36, %v4255_v43 }
 0x2e4   :  { %v1779_v34 = vand.u32 4294901760, %v1778_v53 }
 0x2e6   :  { %v1780_v25 = vsub.f32 %v1778_v53, %v1779_v34 }
 0x2e8   :  { %v1781_v33 = vand.u32 4294901760, %v1780_v25 }
 0x2ea   :  { %2945 = vmatmul.mubr.f32.vlgmr.msra.gmra.mrb[12].mxu1 %v1781_v33 }
 0x2eb   :  { %3310 = vmatpush3.bf16.msra.mxu1 %v3938_v35  ;;  %2979 = vmatprep.mubr.msk.f32.mxu1 %vm3609_vm0, %v3610_v1 }
 0x2ec   :  { %3311 = vmatprep.subr.bf16.mxu1 %v3608_v0 }
 0x2ef   :  { %3313 = vmatpush3.bf16.msra.mxu1 %v3958_v44 }
 0x2f0   :  { %3314 = vmatprep.subr.bf16.mxu1 %v3608_v0 }
 0x2f3   :  { %3316 = vmatpush3.bf16.msra.mxu1 %v3978_v55 }
 0x2f4   :  { %3317 = vmatprep.subr.bf16.mxu1 %v3608_v0 }
 0x2f7   :  { %3319 = vmatpush3.bf16.msra.mxu1 %v4014_v28 }
 0x2f8   :  { %3320 = vmatprep.subr.bf16.mxu1 %v3608_v0 }
 0x2fb   :  { %3322 = vmatpush3.bf16.msra.mxu1 %v4018_v40 }
 0x2fc   :  { %3323 = vmatprep.subr.bf16.mxu1 %v3608_v0 }
 0x2ff   :  { %3325 = vmatpush3.bf16.msra.mxu1 %v4038_v51 }
 0x300   :  { %3326 = vmatprep.subr.bf16.mxu1 %v3608_v0 }
 0x303   :  { %3328 = vmatpush3.bf16.msra.mxu1 %v4064_v21 }
 0x304   :  { %3329 = vmatprep.subr.bf16.mxu1 %v3608_v0 }
 0x307   :  { %3331 = vmatpush3.bf16.msra.mxu1 %v4066_v5 }
 0x308   :  { %3332 = vmatprep.subr.bf16.mxu1 %v3608_v0 }
 0x30a   :  { %2980 = vmatmul.mubr.f32.vlgmr.msra.gmra.mrb[12].mxu1 %v4255_v43 }
 0x30b   :  { %3334 = vmatpush3.bf16.msra.mxu1 %v4070_v31  ;;  %3014 = vmatprep.mubr.msk.f32.mxu1 %vm3609_vm0, %v3610_v1 }
 0x30c   :  { %3335 = vmatprep.subr.bf16.mxu1 %v3608_v0 }
 0x30f   :  { %3337 = vmatpush3.bf16.msra.mxu1 %v4074_v32 }
 0x310   :  { %3338 = vmatprep.subr.bf16.mxu1 %v3608_v0 }
 0x313   :  { %3340 = vmatpush3.bf16.msra.mxu1 %v4078_v8 }
 0x314   :  { %3341 = vmatprep.subr.bf16.mxu1 %v3608_v0 }
 0x317   :  { %3343 = vmatpush3.bf16.msra.mxu1 %v4082_v10 }
 0x318   :  { %3344 = vmatprep.subr.bf16.mxu1 %v3608_v0 }
 0x31b   :  { %3346 = vmatpush3.bf16.msra.mxu1 %v4086_v41 }
 0x31c   :  { %3347 = vmatprep.subr.bf16.mxu1 %v3608_v0 }
 0x31f   :  { %3349 = vmatpush3.bf16.msra.mxu1 %v4090_v45 }
 0x320   :  { %3350 = vmatprep.subr.bf16.mxu1 %v3608_v0 }
 0x323   :  { %3352 = vmatpush3.bf16.msra.mxu1 %v4094_v56 }
 0x324   :  { %3353 = vmatprep.subr.bf16.mxu1 %v3608_v0 }
 0x327   :  { %3355 = vmatpush3.bf16.msra.mxu1 %v4098_v15 }
 0x328   :  { %3356 = vmatprep.subr.bf16.mxu1 %v3608_v0 }
 0x32a   :  { %3015 = vmatmul.mubr.f32.vlgmr.msra.gmra.mrb[12].mxu1 %v1778_v53 }
 0x32b   :  { %3358 = vmatpush3.bf16.msra.mxu1 %v3796_v49  ;;  %3049 = vmatprep.mubr.msk.f32.mxu1 %vm3609_vm0, %v3610_v1 }
 0x32c   :  { %3359 = vmatprep.subr.bf16.mxu1 %v3608_v0 }
 0x32f   :  { %3361 = vmatpush3.bf16.msra.mxu1 %v3812_v54 }
 0x330   :  { %3362 = vmatprep.subr.bf16.mxu1 %v3608_v0 }
 0x333   :  { %3364 = vmatpush3.bf16.msra.mxu1 %v3828_v59 }
 0x334   :  { %3365 = vmatprep.subr.bf16.mxu1 %v3608_v0 }
 0x337   :  { %3367 = vmatpush3.bf16.msra.mxu1 %v3844_v2 }
 0x338   :  { %3368 = vmatprep.subr.bf16.mxu1 %v3608_v0 }
 0x33b   :  { %3370 = vmatpush3.bf16.msra.mxu1 %v3860_v7 }
 0x33c   :  { %3371 = vmatprep.subr.bf16.mxu1 %v3608_v0 }
 0x33f   :  { %3373 = vmatpush3.bf16.msra.mxu1 %v3876_v12 }
 0x340   :  { %3374 = vmatprep.subr.bf16.mxu1 %v3608_v0 }
 0x343   :  { %3376 = vmatpush3.bf16.msra.mxu1 %v3892_v17 }
 0x344   :  { %3377 = vmatprep.subr.bf16.mxu1 %v3608_v0 }
 0x347   :  { %3379 = vmatpush3.bf16.msra.mxu1 %v3914_v26 }
 0x348   :  { %3380 = vmatprep.subr.bf16.mxu1 %v3608_v0 }
 0x34a   :  { %3050 = vmatmul.mubr.f32.vlgmr.msra.gmra.mrb[12].mxu1 %v1779_v34 }
 0x34b   :  { %3382 = vmatpush3.bf16.msra.mxu1 %v4168_v27  ;;  %3084 = vmatprep.mubr.msk.f32.mxu1 %vm3609_vm0, %v3610_v1 }
 0x34c   :  { %3383 = vmatprep.subr.bf16.mxu1 %v3608_v0 }
 0x34f   :  { %3385 = vmatpush3.bf16.msra.mxu1 %v4176_v23 }
 0x350   :  { %3386 = vmatprep.subr.bf16.mxu1 %v3608_v0 }
 0x353   :  { %3388 = vmatpush3.bf16.msra.mxu1 %v4186_v22 }
 0x354   :  { %3389 = vmatprep.subr.bf16.mxu1 %v3608_v0 }
 0x357   :  { %3391 = vmatpush3.bf16.msra.mxu1 %v4194_v60 }
 0x358   :  { %3392 = vmatprep.subr.bf16.mxu1 %v3608_v0 }
 0x35b   :  { %3394 = vmatpush3.bf16.msra.mxu1 %v4202_v3 }
 0x35c   :  { %3395 = vmatprep.subr.bf16.mxu1 %v3608_v0 }
 0x35f   :  { %3397 = vmatpush3.bf16.msra.mxu1 %v4210_v50 }
 0x360   :  { %3398 = vmatprep.subr.bf16.mxu1 %v3608_v0 }
 0x363   :  { %3400 = vmatpush3.bf16.msra.mxu1 %v4218_v37 }
 0x364   :  { %3401 = vmatprep.subr.bf16.mxu1 %v3608_v0 }
 0x367   :  { %3403 = vmatpush3.bf16.msra.mxu1 %v4226_v61 }
 0x368   :  { %3404 = vmatprep.subr.bf16.mxu1 %v3608_v0 }
 0x36a   :  { %3085 = vmatmul.mubr.f32.vlgmr.msra.gmra.mrb[12].mxu1 %v4255_v43 }
 0x36b   :  { %3406 = vmatpush3.bf16.msra.mxu1 %v3796_v49  ;;  %3119 = vmatprep.mubr.msk.f32.mxu1 %vm3609_vm0, %v3610_v1 }
 0x36c   :  { %3407 = vmatprep.subr.bf16.mxu1 %v3608_v0 }
 0x36f   :  { %3409 = vmatpush3.bf16.msra.mxu1 %v3812_v54 }
 0x370   :  { %3410 = vmatprep.subr.bf16.mxu1 %v3608_v0 }
 0x373   :  { %3412 = vmatpush3.bf16.msra.mxu1 %v3828_v59 }
 0x374   :  { %3413 = vmatprep.subr.bf16.mxu1 %v3608_v0 }
 0x377   :  { %3415 = vmatpush3.bf16.msra.mxu1 %v3844_v2 }
 0x378   :  { %3416 = vmatprep.subr.bf16.mxu1 %v3608_v0 }
 0x37b   :  { %3418 = vmatpush3.bf16.msra.mxu1 %v3860_v7  ;;  %v2376_v7 = vld [vmem:[%s4375_s6] ss:$0 sm:$0xff] }
 0x37c   :  { %3419 = vmatprep.subr.bf16.mxu1 %v3608_v0 }
 0x37f   :  { %3421 = vmatpush3.bf16.msra.mxu1 %v3876_v12 }
 0x380   :  { %3422 = vmatprep.subr.bf16.mxu1 %v3608_v0 }
 0x383   :  { %3424 = vmatpush3.bf16.msra.mxu1 %v3892_v17 }
 0x384   :  { %3425 = vmatprep.subr.bf16.mxu1 %v3608_v0  ;;  %v2377_v0 = vld [vmem:[%s4376_s7] ss:$0 sm:$0xff] }
 0x387   :  { %3427 = vmatpush3.bf16.msra.mxu1 %v3914_v26 }
 0x38a   :  { %3120 = vmatmul.mubr.f32.vlgmr.msra.gmra.mrb[12].mxu1 %v4255_v43 }
 0x45d   :  { %v2333_v1 = vpop.f32.mrb[12].mxu1 }
 0x45e   :  { %v2337_v49 = vmul.f32 0.03125, %v2333_v1  ;;  %v3121_v54 = vpop.f32.mrb[13].mxu1 }
 0x460   :  { %v2338_v59 = vadd.f32 1e-05, %v2337_v49 }
 0x462   :  { %3459 = vrsqrt.f32 %v2338_v59 }
 0x46c   :  { %v3460_v2 = vpop.eup %3459 }
 0x46d   :  { %v2340_v12 = vmul.f32 %v3460_v2, %v4251_v14 }
 0x46f   :  { %v2348_v17 = vmul.f32 %v2376_v7, %v2340_v12 }
 0x471   :  { %v2356_v26 = vadd.f32 %v2377_v0, %v2348_v17 }
 0x473   :  { %2357 = vst [vmem:[#allocation11] sm:$0xf] %v2356_v26 }
 0x474   :  { %3582 = shalt.err (!%p3579_p2)
}
 0x475   :  { %s3583_s25 = scalar_lea.hbm %s4377_s8, 64 }
 0x476   :  { %p3584_p3 = scmp.ne.s32.totalorder %s4377_s8, %s3583_s25  ;;  %p3587_p4 = scmp.lt.u32.totalorder %s3583_s25, %s4377_s8 }
 0x478   :  { %p3589_p5 = pnand %p3587_p4, %p3584_p3 }
 0x47a   :  { %3592 = shalt.err (!%p3589_p5)
}
 0x47b   :  { %2367 = dma.vmem_to_hbm [thread:$0]  %s2365_s22, 64, %s4377_s8, [#allocation4]  }
 0x47c   :  { %3599 = dma.done.wait [#allocation4], 64  }
 0x47d   :  { %3600 = vsyncadd [#allocation4], 4294967232 }
 0x47e   :  { %2371 = vsyncpa [#allocation3], 1 }
 0x47f   :  { %2372 = vsyncpa [#allocation6], 1 }
 0x480   :  { %2373 = vsyncpa [#allocation9], 1 }
 0x481   :  { %2374 = vsyncpa [#allocation4], 1 }

</bundles_post_ra>
